<compile_context>
chip_gen: v7x
topology: tpu7x:2x2x1
jax: 0.10.0
libtpu: 0.0.40
codegen_flags: <defaults>
</compile_context>

<pallas_src>
import numpy as np
import jax
import jax.numpy as jnp
from jax.experimental import pallas as pl
from jax.experimental.pallas import tpu as pltpu

LANE = 128  # slab width: every operand is lane-aligned at column 0


# ------------------------------ slab packing ------------------------------ #
def pack_slab(named_arrays):
    """Concatenate small 2-D f32 operands into one (rows, 128) slab.

    Each operand starts at a sublane-aligned row (multiple of 8) and column 0, so
    in-kernel static slices `ref[r0:r0+r, 0:c]` are aligned sub-vreg reads.
    Returns (slab, {name: (row_offset, (rows, cols))}).
    """
    bands, offsets, r = [], {}, 0
    for name, arr in named_arrays:
        arr = np.asarray(arr, np.float32)
        rows = ((arr.shape[0] + 7) // 8) * 8
        band = np.zeros((rows, LANE), np.float32)
        band[:arr.shape[0], :arr.shape[1]] = arr
        bands.append(band)
        offsets[name] = (r, arr.shape)
        r += rows
    return np.concatenate(bands, axis=0), offsets


# ------------------------------ Pallas kernel ------------------------------ #
def make_communitynet_kernel(g_off, w_off):
    """Kernel closure over the static slab offsets (known at trace time)."""

    def _sl(ref, off, name):
        r0, (rr, cc) = off[name]
        return ref[r0:r0 + rr, 0:cc]          # static, aligned slice of the slab

    def kernel(g_ref, w_ref, o_ref):
        # graph slab
        a_bd = _sl(g_ref, g_off, "a_bd")      # (CN, CN) block-diag adjacency (+self loops)
        x_bd = _sl(g_ref, g_off, "x_bd")      # (CN, F)  concatenated community features
        p1p  = _sl(g_ref, g_off, "p1p")       # (NP, CN) ic_adj @ masked-mean pooling
        b2p  = _sl(g_ref, g_off, "b2p")       # (NP, O1) rowsum(ic_adj) * b2
        p2   = _sl(g_ref, g_off, "p2")        # (1,  NP) masked-mean readout
        # weights slab
        w1 = _sl(w_ref, w_off, "W1")          # (F,  H1)
        b1 = _sl(w_ref, w_off, "b1")          # (1,  H1)
        w2 = _sl(w_ref, w_off, "W2")          # (H1, O1)
        v1 = _sl(w_ref, w_off, "V1")          # (O1, H2)
        c1 = _sl(w_ref, w_off, "c1")          # (1,  H2)
        v2 = _sl(w_ref, w_off, "V2")          # (H2, O2)
        c2 = _sl(w_ref, w_off, "c2")          # (1,  O2)

        # ---- stage 1: ensemble of community GNNs (block-diagonal batching) ----
        agg1 = jnp.dot(a_bd, x_bd, preferred_element_type=jnp.float32)          # (CN, F)
        h1 = jnp.maximum(
            jnp.dot(agg1, w1, preferred_element_type=jnp.float32) + b1, 0.0)    # (CN, H1)

        # ---- stage 2: output GNN on the intercommunity graph (folded on host) ----
        # agg2 = ic_adj @ (p1 @ h1 @ W2 + 1 b2)  ==  (P1' @ h1) @ W2 + b2'
        t = jnp.dot(p1p, h1, preferred_element_type=jnp.float32)                # (NP, H1)
        agg2 = jnp.dot(t, w2, preferred_element_type=jnp.float32) + b2p         # (NP, O1)
        h2 = jnp.maximum(
            jnp.dot(agg2, v1, preferred_element_type=jnp.float32) + c1, 0.0)    # (NP, H2)
        pooled2 = jnp.dot(p2, h2, preferred_element_type=jnp.float32)           # (1,  H2)
        o_ref[...] = jnp.dot(pooled2, v2,
                             preferred_element_type=jnp.float32) + c2           # (1,  O2)

    return kernel


def communitynet_forward(graph_slab, weight_slab, g_off, w_off):
    """Single fused kernel: community GNN ensemble + intercommunity output GNN."""
    CN, F = g_off["x_bd"][1]
    NP = g_off["p1p"][1][0]
    H1 = w_off["W1"][1][1]
    O1 = w_off["W2"][1][1]
    H2 = w_off["V1"][1][1]
    O2 = w_off["V2"][1][1]
    flops = 2 * (CN * CN * F          # agg1
                 + CN * F * H1        # h1
                 + NP * CN * H1       # t
                 + NP * H1 * O1       # agg2
                 + NP * O1 * H2       # h2
                 + NP * H2            # pooled2
                 + H2 * O2)           # out
    bytes_accessed = 4 * (graph_slab.size + weight_slab.size + O2)

    vmem = pl.BlockSpec(memory_space=pltpu.MemorySpace.VMEM)
    return pl.pallas_call(
        make_communitynet_kernel(g_off, w_off),
        out_shape=jax.ShapeDtypeStruct((1, O2), jnp.float32),
        in_specs=[vmem, vmem],
        out_specs=vmem,
        cost_estimate=pl.CostEstimate(flops=flops, transcendentals=0,
                                      bytes_accessed=bytes_accessed),
    )(graph_slab, weight_slab)


# -------------------------------- graph glue -------------------------------- #
# TODO(synk): the data-dependent community/edge filtering of _extract_communities and
# _build_intercommunity_graph (Python loops over edge lists) stays on the host in numpy;
# only the dense numerical forward runs in the Pallas kernel.
def extract_community_adjacency(edges, attrs, communities, n_pad):
    """_extract_communities equivalent (dense, with self loops). Reference only."""
    C = len(communities)
    adj = np.zeros((C, n_pad, n_pad), np.float32)
    for c, community in enumerate(communities):
        node_to_c = {n: i for i, n in enumerate(community)}
        for (s, t), a in zip(edges, attrs):
            if s in node_to_c and t in node_to_c:          # edge fully within community
                adj[c, node_to_c[t], node_to_c[s]] += a    # message s -> t
        adj[c, :len(community), :len(community)] += np.eye(len(community), dtype=np.float32)
    return adj


def build_block_diagonal_community_graph(edges, attrs, communities, node_x, n_pad_ic):
    """Kernel-side layout: block-diagonal adjacency over all communities, concatenated
    node features, and a (n_pad_ic, total_nodes) masked-mean pooling matrix."""
    sizes = [len(c) for c in communities]
    offsets = np.cumsum([0] + sizes)
    CN = int(offsets[-1])
    a_bd = np.zeros((CN, CN), np.float32)
    x_bd = np.concatenate([node_x[c] for c in communities], axis=0).astype(np.float32)
    p1 = np.zeros((n_pad_ic, CN), np.float32)
    for c, community in enumerate(communities):
        node_to_c = {n: i for i, n in enumerate(community)}
        off = int(offsets[c])
        for (s, t), a in zip(edges, attrs):
            if s in node_to_c and t in node_to_c:
                a_bd[off + node_to_c[t], off + node_to_c[s]] += a
        a_bd[off:off + sizes[c], off:off + sizes[c]] += np.eye(sizes[c], dtype=np.float32)
        p1[c, off:off + sizes[c]] = 1.0 / max(sizes[c], 1)   # masked mean, count clamped
    return a_bd, x_bd, p1


def build_intercommunity_graph(edges, attrs, communities, n_pad):
    """Faithful _build_intercommunity_graph: j <= i, src in comm i, targ in comm j,
    symmetric edge with mean attribute.  Padded adjacency (+ self loops) and readout."""
    C = len(communities)
    ic = np.zeros((n_pad, n_pad), np.float32)
    for i in range(C):
        src_comm = set(communities[i])
        for j in range(C):
            if j > i:
                break
            targ_comm = set(communities[j])
            vals = [a for (s, t), a in zip(edges, attrs) if s in src_comm and t in targ_comm]
            if not vals:
                continue
            m = float(np.mean(vals))
            ic[i, j] = m
            ic[j, i] = m
    ic[:C, :C] += np.eye(C, dtype=np.float32)                # self loops for output GNN
    p2 = np.zeros((1, n_pad), np.float32)
    p2[0, :C] = 1.0 / max(C, 1)                              # masked mean, count clamped
    return ic, p2


# --------------------------------- reference -------------------------------- #
def _gnn_ref(adj, x, mask, w1, b1, w2, b2):
    agg = adj @ x
    h = np.maximum(agg @ w1 + b1, 0.0) * mask
    pooled = h.sum(axis=1) / np.maximum(mask.sum(axis=1), 1.0)
    return pooled @ w2 + b2


# ----------------------------------- main ------------------------------------ #
if __name__ == "__main__":
    C = 3            # num communities
    NCOMM = 8        # nodes per community
    N = C * NCOMM    # total nodes
    F = 16           # node feature dim
    H1, O1 = 32, 16  # base GNN hidden / community embedding dim
    H2, O2 = 32, 8   # output GNN hidden / final output dim
    N_PAD = 8        # padded node count for the intercommunity graph

    key = jax.random.PRNGKey(0)
    kx, k1, k2, k3, k4, kb1, kb2, kb3, kb4 = jax.random.split(key, 9)

    # ---- synthetic graph (deterministic) ----
    communities = [list(range(c * NCOMM, (c + 1) * NCOMM)) for c in range(C)]
    node_x = np.asarray(jax.random.normal(kx, (N, F), dtype=jnp.float32))

    edges, attrs = [], []
    for c in range(C):                      # ring inside each community
        base = c * NCOMM
        for k in range(NCOMM):
            edges.append((base + k, base + (k + 1) % NCOMM))
            attrs.append(0.1 * len(attrs) + 0.1)
    for (s, t) in [(0, 8), (8, 16), (16, 0), (3, 11), (11, 19), (19, 3), (5, 13)]:
        edges.append((s, t))                # cross-community edges
        attrs.append(0.05 * len(attrs) + 0.05)

    # ---- parameters (deepcopy semantics: one set of base-GNN weights shared) ----
    W1 = np.asarray(jax.random.normal(k1, (F, H1), dtype=jnp.float32)) / np.sqrt(F)
    b1 = np.asarray(jax.random.normal(kb1, (1, H1), dtype=jnp.float32)) * 0.1
    W2 = np.asarray(jax.random.normal(k2, (H1, O1), dtype=jnp.float32)) / np.sqrt(H1)
    b2 = np.asarray(jax.random.normal(kb2, (1, O1), dtype=jnp.float32)) * 0.1
    V1 = np.asarray(jax.random.normal(k3, (O1, H2), dtype=jnp.float32)) / np.sqrt(O1)
    c1 = np.asarray(jax.random.normal(kb3, (1, H2), dtype=jnp.float32)) * 0.1
    V2 = np.asarray(jax.random.normal(k4, (H2, O2), dtype=jnp.float32)) / np.sqrt(H2)
    c2 = np.asarray(jax.random.normal(kb4, (1, O2), dtype=jnp.float32)) * 0.1

    # ---- host-side graph preprocessing (data-dependent edge filtering stays in numpy) ----
    a_bd, x_bd, p1 = build_block_diagonal_community_graph(
        edges, attrs, communities, node_x, N_PAD)                 # (24,24), (24,F), (8,24)
    ic_adj, p2 = build_intercommunity_graph(edges, attrs, communities, N_PAD)  # (8,8), (1,8)

    # ---- host-side algebra folds (perf review): drop ic_adj & b2 from the kernel ----
    P1p = (ic_adj @ p1).astype(np.float32)                                      # (8, 24)
    b2p = (ic_adj.sum(axis=1, keepdims=True) @ b2).astype(np.float32)           # (8, O1)

    # ---- pack all operands into 2 lane-aligned slabs (2 DMAs instead of 13) ----
    graph_slab, g_off = pack_slab(
        [("a_bd", a_bd), ("x_bd", x_bd), ("p1p", P1p), ("b2p", b2p), ("p2", p2)])
    weight_slab, w_off = pack_slab(
        [("W1", W1), ("b1", b1), ("W2", W2), ("V1", V1), ("c1", c1), ("V2", V2), ("c2", c2)])

    # ---- single fused Pallas kernel: both GNN stages in one launch ----
    final = communitynet_forward(jnp.asarray(graph_slab), jnp.asarray(weight_slab),
                                 g_off, w_off)                                   # (1, O2)
    final = jax.block_until_ready(final)

    # ---- pure-numpy reference (original per-community formulation) ----
    comm_adj = extract_community_adjacency(edges, attrs, communities, NCOMM)     # (C, 8, 8)
    comm_x = np.stack([node_x[comm] for comm in communities]).astype(np.float32)
    comm_mask = np.ones((C, NCOMM, 1), np.float32)
    ref_embeds = _gnn_ref(comm_adj, comm_x, comm_mask, W1, b1, W2, b2)           # (C, O1)

    ref_ic_adj = ic_adj[None]                                                    # (1, 8, 8)
    ref_ic_x = np.zeros((1, N_PAD, O1), np.float32)
    ref_ic_x[0, :C, :] = ref_embeds
    ref_ic_mask = np.zeros((1, N_PAD, 1), np.float32)
    ref_ic_mask[0, :C, 0] = 1.0
    ref_final = _gnn_ref(ref_ic_adj, ref_ic_x, ref_ic_mask, V1, c1, V2, c2)      # (1, O2)

    assert np.allclose(np.asarray(final), ref_final, atol=1e-4, rtol=1e-4), \
        (np.asarray(final), ref_final)
    print("KERNEL_OK")
</pallas_src>

<mosaic_0001>
module attributes {stable_mosaic.version = 11 : i64} {
  func.func @kernel(%arg0: memref<72x128xf32, #tpu.memory_space<vmem>>, %arg1: memref<120x128xf32, #tpu.memory_space<vmem>>, %arg2: memref<1x8xf32, #tpu.memory_space<vmem>>) attributes {dimension_semantics = [], scalar_prefetch = 0 : i64, scratch_operands = 0 : i64, tpu.core_type = #tpu.core_type<tc>} {
    %c0 = arith.constant 0 : index
    %c0_0 = arith.constant 0 : index
    %0 = vector.load %arg0[%c0, %c0_0] : memref<72x128xf32, #tpu.memory_space<vmem>>, vector<24x24xf32>
    %c24 = arith.constant 24 : index
    %c0_1 = arith.constant 0 : index
    %1 = vector.load %arg0[%c24, %c0_1] : memref<72x128xf32, #tpu.memory_space<vmem>>, vector<24x16xf32>
    %c48 = arith.constant 48 : index
    %c0_2 = arith.constant 0 : index
    %2 = vector.load %arg0[%c48, %c0_2] : memref<72x128xf32, #tpu.memory_space<vmem>>, vector<8x24xf32>
    %c56 = arith.constant 56 : index
    %c0_3 = arith.constant 0 : index
    %3 = vector.load %arg0[%c56, %c0_3] : memref<72x128xf32, #tpu.memory_space<vmem>>, vector<8x16xf32>
    %c64 = arith.constant 64 : index
    %c0_4 = arith.constant 0 : index
    %4 = vector.load %arg0[%c64, %c0_4] : memref<72x128xf32, #tpu.memory_space<vmem>>, vector<1x8xf32>
    %c0_5 = arith.constant 0 : index
    %c0_6 = arith.constant 0 : index
    %5 = vector.load %arg1[%c0_5, %c0_6] : memref<120x128xf32, #tpu.memory_space<vmem>>, vector<16x32xf32>
    %c16 = arith.constant 16 : index
    %c0_7 = arith.constant 0 : index
    %6 = vector.load %arg1[%c16, %c0_7] : memref<120x128xf32, #tpu.memory_space<vmem>>, vector<1x32xf32>
    %c24_8 = arith.constant 24 : index
    %c0_9 = arith.constant 0 : index
    %7 = vector.load %arg1[%c24_8, %c0_9] : memref<120x128xf32, #tpu.memory_space<vmem>>, vector<32x16xf32>
    %c56_10 = arith.constant 56 : index
    %c0_11 = arith.constant 0 : index
    %8 = vector.load %arg1[%c56_10, %c0_11] : memref<120x128xf32, #tpu.memory_space<vmem>>, vector<16x32xf32>
    %c72 = arith.constant 72 : index
    %c0_12 = arith.constant 0 : index
    %9 = vector.load %arg1[%c72, %c0_12] : memref<120x128xf32, #tpu.memory_space<vmem>>, vector<1x32xf32>
    %c80 = arith.constant 80 : index
    %c0_13 = arith.constant 0 : index
    %10 = vector.load %arg1[%c80, %c0_13] : memref<120x128xf32, #tpu.memory_space<vmem>>, vector<32x8xf32>
    %c112 = arith.constant 112 : index
    %c0_14 = arith.constant 0 : index
    %11 = vector.load %arg1[%c112, %c0_14] : memref<120x128xf32, #tpu.memory_space<vmem>>, vector<1x8xf32>
    %cst = arith.constant dense<0.000000e+00> : vector<24x16xf32>
    %12 = tpu.matmul %0, %1, %cst {dimension_numbers = #tpu.dot_dimension_numbers<[1], [0], [0], [1], [0, 0, 1, 1], [], []>} : vector<24x24xf32>, vector<24x16xf32>, vector<24x16xf32> -> vector<24x16xf32>
    %cst_15 = arith.constant dense<0.000000e+00> : vector<24x32xf32>
    %13 = tpu.matmul %12, %5, %cst_15 {dimension_numbers = #tpu.dot_dimension_numbers<[1], [0], [0], [1], [0, 0, 1, 1], [], []>} : vector<24x16xf32>, vector<16x32xf32>, vector<24x32xf32> -> vector<24x32xf32>
    %14 = vector.broadcast %6 : vector<1x32xf32> to vector<24x32xf32>
    %15 = arith.addf %13, %14 : vector<24x32xf32>
    %cst_16 = arith.constant 0.000000e+00 : f32
    %16 = vector.broadcast %cst_16 : f32 to vector<24x32xf32>
    %17 = arith.maximumf %15, %16 : vector<24x32xf32>
    %cst_17 = arith.constant dense<0.000000e+00> : vector<8x32xf32>
    %18 = tpu.matmul %2, %17, %cst_17 {dimension_numbers = #tpu.dot_dimension_numbers<[1], [0], [0], [1], [0, 0, 1, 1], [], []>} : vector<8x24xf32>, vector<24x32xf32>, vector<8x32xf32> -> vector<8x32xf32>
    %cst_18 = arith.constant dense<0.000000e+00> : vector<8x16xf32>
    %19 = tpu.matmul %18, %7, %cst_18 {dimension_numbers = #tpu.dot_dimension_numbers<[1], [0], [0], [1], [0, 0, 1, 1], [], []>} : vector<8x32xf32>, vector<32x16xf32>, vector<8x16xf32> -> vector<8x16xf32>
    %20 = arith.addf %19, %3 : vector<8x16xf32>
    %cst_19 = arith.constant dense<0.000000e+00> : vector<8x32xf32>
    %21 = tpu.matmul %20, %8, %cst_19 {dimension_numbers = #tpu.dot_dimension_numbers<[1], [0], [0], [1], [0, 0, 1, 1], [], []>} : vector<8x16xf32>, vector<16x32xf32>, vector<8x32xf32> -> vector<8x32xf32>
    %22 = vector.broadcast %9 : vector<1x32xf32> to vector<8x32xf32>
    %23 = arith.addf %21, %22 : vector<8x32xf32>
    %cst_20 = arith.constant 0.000000e+00 : f32
    %24 = vector.broadcast %cst_20 : f32 to vector<8x32xf32>
    %25 = arith.maximumf %23, %24 : vector<8x32xf32>
    %cst_21 = arith.constant dense<0.000000e+00> : vector<1x32xf32>
    %26 = tpu.matmul %4, %25, %cst_21 {dimension_numbers = #tpu.dot_dimension_numbers<[1], [0], [0], [1], [0, 0, 1, 1], [], []>} : vector<1x8xf32>, vector<8x32xf32>, vector<1x32xf32> -> vector<1x32xf32>
    %cst_22 = arith.constant dense<0.000000e+00> : vector<1x8xf32>
    %27 = tpu.matmul %26, %10, %cst_22 {dimension_numbers = #tpu.dot_dimension_numbers<[1], [0], [0], [1], [0, 0, 1, 1], [], []>} : vector<1x32xf32>, vector<32x8xf32>, vector<1x8xf32> -> vector<1x8xf32>
    %28 = arith.addf %27, %11 : vector<1x8xf32>
    %c0_23 = arith.constant 0 : index
    %c0_24 = arith.constant 0 : index
    %29 = vector.load %arg2[%c0_23, %c0_24] : memref<1x8xf32, #tpu.memory_space<vmem>>, vector<1x8xf32>
    tpu.vector_store %arg2[%c0_23, %c0_24], %28 {strides = array<i32>} : memref<1x8xf32, #tpu.memory_space<vmem>>, vector<1x8xf32>,
    return
  }
}

</mosaic_0001>

<bundles_post_ra>
// kernel: tpu_custom_call.1
= control target key start
LH: loop header
LB: loop body
LE: loop exit
PB: predicated region body
PF: predicated region fallthrough
CT: control target
= control target key end

     0   :  { %7 = vsyncpa [#allocation3], 0  ;;  %s961_s0 = inlined_call_operand.hbm [shape: f32[72,128], index: 0, kind: input, shape index: {}]   ;;  %s962_s1 = inlined_call_operand.hbm [shape: f32[120,128], index: 1, kind: input, shape index: {}]   ;;  %s963_s2 = inlined_call_operand.hbm [shape: f32[1,8], index: 2, kind: output, shape index: {}]  }
   0x1   :  { %8 = vsyncpa [#allocation6], 0 }
   0x2   :  { %9 = vsyncpa [#allocation4], 0  ;;  %s859_s9 = smov [#allocation2]   ;;  %s787_s13 = scalar_lea.hbm %s961_s0, 1152 }
   0x3   :  { %s15_s10 = sshll.u32 %s859_s9, 4  ;;  %p788_p0 = scmp.ne.s32.totalorder %s961_s0, %s787_s13  ;;  %s16_s10 = int_to_ptr.vmem [resolvable:$true] %s15_s10 }
   0x4   :  { %p791_p1 = scmp.lt.u32.totalorder %s787_s13, %s961_s0 }
   0x6   :  { %p793_p2 = pnand %p791_p1, %p788_p0 }
   0x8   :  { %796 = shalt.err (!%p793_p2)
}
   0x9   :  { %s797_s18 = scalar_lea.vmem %s16_s10, 1152  ;;  %p802_p4 = scmp.lt.s32.totalorder %s16_s10, %s16_s10 }
   0xa   :  { %p798_p3 = scmp.ne.s32.totalorder %s16_s10, %s797_s18  ;;  %p803_p5 = scmp.lt.s32.totalorder %s797_s18, %s797_s18 }
   0xc   :  { %p804_p6 = por %p803_p5, %p802_p4 }
   0xe   :  { %p805_p7 = pnand %p804_p6, %p798_p3 }
  0x10   :  { %808 = shalt.err (!%p805_p7)
}
  0x11   :  { %s860_s19 = smov 128   ;;  %s861_s20 = smov 8  }
  0x12   :  { %21 = dma.hbm_to_vmem [thread:$0]  %s961_s0, 1152, %s16_s10, [#allocation3], %s860_s19, %s860_s19, %s861_s20  }
  0x13   :  { %s862_s23 = smov [#allocation5]   ;;  %s809_s27 = scalar_lea.hbm %s962_s1, 1920 }
  0x14   :  { %s27_s24 = sshll.u32 %s862_s23, 4  ;;  %p810_p8 = scmp.ne.s32.totalorder %s962_s1, %s809_s27  ;;  %s28_s24 = int_to_ptr.vmem [resolvable:$true] %s27_s24 }
  0x15   :  { %p813_p9 = scmp.lt.u32.totalorder %s809_s27, %s962_s1 }
  0x17   :  { %p815_p10 = pnand %p813_p9, %p810_p8 }
  0x19   :  { %818 = shalt.err (!%p815_p10)
}
  0x1a   :  { %s819_s4 = scalar_lea.vmem %s28_s24, 1920  ;;  %p824_p12 = scmp.lt.s32.totalorder %s28_s24, %s28_s24 }
  0x1b   :  { %p820_p11 = scmp.ne.s32.totalorder %s28_s24, %s819_s4  ;;  %p825_p13 = scmp.lt.s32.totalorder %s819_s4, %s819_s4 }
  0x1d   :  { %p826_p0 = por %p825_p13, %p824_p12 }
  0x1f   :  { %p827_p1 = pnand %p826_p0, %p820_p11 }
  0x21   :  { %830 = shalt.err (!%p827_p1)
}
  0x22   :  { %33 = dma.hbm_to_vmem [thread:$0]  %s962_s1, 1920, %s28_s24, [#allocation6], %s860_s19, %s860_s19, %s861_s20  }
  0x23   :  { %853 = dma.done.wait [#allocation3], 1152  }
  0x24   :  { %854 = vsyncadd [#allocation3], 4294966144 }
  0x25   :  { %855 = dma.done.wait [#allocation6], 1920  }
  0x26   :  { %856 = vsyncadd [#allocation6], 4294965376  ;;  %v863_v0 = vmov 0.0|0.0   ;;  %vm864_vm0 = vmmov 0   ;;  %v865_v1 = vmov 0.0   ;;  %v43_v2 = vld [vmem:[#allocation2 + $0x18] sm:$0xff] }
  0x27   :  { %755 = vmatprep.subr.bf16.mxu0 %v863_v0  ;;  %690 = vmatprep.mubr.msk.f32.mxu0 %vm864_vm0, %v865_v1  ;;  %v44_v3 = vld [vmem:[#allocation2 + $0x20] sm:$0xff]  ;;  %v49_v5 = vld [vmem:[#allocation5] sm:$0xff]  ;;  %v50_v6 = vld [vmem:[#allocation5 + $0x8] sm:$0xff]  ;;  %vm64_vm1 = vcmask 195584   ;;  %vm158_vm2 = vcmask 130048   ;;  %vm324_vm3 = vcmask 261120  }
  0x28   :  { %758 = vmatprep.subr.bf16.mxu1 %v863_v0  ;;  %703 = vmatprep.mubr.msk.f32.mxu1 %vm864_vm0, %v865_v1  ;;  %v756_v4 = vpack.c.bf16 %v44_v3, %v43_v2  ;;  %v759_v7 = vpack.c.bf16 %v50_v6, %v49_v5  ;;  %v45_v8 = vld [vmem:[#allocation2 + $0x28] sm:$0xff]  ;;  %v40_v9 = vld [vmem:[#allocation2] sm:$0xff]  ;;  %v42_v11 = vld [vmem:[#allocation2 + $0x10] sm:$0xff]  ;;  %vm476_vm4 = vcmask 64512   ;;  %s866_s1 = smov [#allocation7]   ;;  %vm623_vm5 = vcmask 57344  }
  0x29   :  { %v41_v10 = vld [vmem:[#allocation2 + $0x8] sm:$0xff]  ;;  %v52_v18 = vld [vmem:[#allocation5 + $0x18] sm:$0xff]  ;;  %v54_v20 = vld [vmem:[#allocation5 + $0x28] sm:$0xff]  ;;  %s631_s6 = sshll.u32 %s866_s1, 4  ;;  %s632_s6 = int_to_ptr.vmem [resolvable:$true] %s631_s6 }
  0x2a   :  { %757 = vmatpush3.bf16.msra.mxu0 %v756_v4  ;;  %760 = vmatpush3.bf16.msra.mxu1 %v759_v7  ;;  %v53_v19 = vld [vmem:[#allocation5 + $0x20] sm:$0xff]  ;;  %v55_v22 = vld [vmem:[#allocation5 + $0x30] sm:$0xff]  ;;  %v46_v38 = vld [vmem:[#allocation2 + $0x30] sm:$0xff]  ;;  %s831_s7 = scalar_lea.vmem %s632_s6, 16  ;;  %s835_s8 = scalar_lea.vmem %s632_s6, 32 }
  0x2b   :  { %688 = vmatprep.subr.mxu0 %v865_v1  ;;  %761 = vmatprep.subr.bf16.mxu1 %v863_v0  ;;  %v765_v21 = vpack.c.bf16 %v53_v19, %v52_v18  ;;  %v768_v23 = vpack.c.bf16 %v55_v22, %v54_v20  ;;  %v644_v24 = vld [vmem:[#allocation5 + $0x10] ss:$0 sm:$0xff]  ;;  %v56_v41 = vld [vmem:[#allocation5 + $0x38] sm:$0xff]  ;;  %v57_v42 = vld [vmem:[#allocation5 + $0x40] sm:$0xff]  ;;  %p832_p2 = scmp.ne.s32.totalorder %s632_s6, %s831_s7  ;;  %p836_p3 = scmp.lt.s32.totalorder %s632_s6, %s632_s6 }
  0x2c   :  { %v771_v43 = vpack.c.bf16 %v57_v42, %v56_v41  ;;  %v47_v44 = vld [vmem:[#allocation2 + $0x38] sm:$0xff]  ;;  %v60_v49 = vld [vmem:[#allocation5 + $0x58] sm:$0xff]  ;;  %v61_v50 = vld [vmem:[#allocation5 + $0x60] sm:$0xff]  ;;  %p837_p4 = scmp.lt.s32.totalorder %s835_s8, %s831_s7 }
  0x2d   :  { %v59_v48 = vld [vmem:[#allocation5 + $0x50] sm:$0xff]  ;;  %v62_v52 = vld [vmem:[#allocation5 + $0x68] sm:$0xff]  ;;  %v48_v59 = vld [vmem:[#allocation2 + $0x40] sm:$0x1] }
  0x2e   :  { %689 = vmatpush3.msra.mxu0 %v45_v8  ;;  %v774_v51 = vpack.c.bf16 %v60_v49, %v59_v48  ;;  %v777_v53 = vpack.c.bf16 %v62_v52, %v61_v50  ;;  %v650_v54 = vld [vmem:[#allocation5 + $0x48] ss:$0 sm:$0xff]  ;;  %v63_v62 = vld [vmem:[#allocation5 + $0x70] sm:$0x1]  ;;  %p838_p5 = por %p837_p4, %p836_p3 }
  0x2f   :  { %691 = vmatmul.mubr.msk.f32.vlgmr.msra.gmra.mrb[0].mxu0 %vm64_vm1, %v40_v9  ;;  %764 = vmatprep.subr.bf16.mxu0 %v863_v0 }
  0x30   :  { %693 = vmatprep.mubr.msk.f32.mxu0 %vm864_vm0, %v865_v1  ;;  %766 = vmatpush3.bf16.msra.mxu0 %v765_v21  ;;  %p839_p6 = pnand %p838_p5, %p832_p2 }
  0x31   :  { %767 = vmatprep.subr.bf16.mxu0 %v863_v0 }
  0x33   :  { %694 = vmatmul.mubr.msk.f32.gmra.mrb[2].mxu0 %vm64_vm1, %v41_v10 }
  0x34   :  { %696 = vmatprep.mubr.msk.f32.mxu0 %vm864_vm0, %v865_v1  ;;  %769 = vmatpush3.bf16.msra.mxu0 %v768_v23 }
  0x35   :  { %770 = vmatprep.subr.bf16.mxu0 %v863_v0 }
  0x37   :  { %697 = vmatmul.mubr.msk.f32.gmra.mrb[4].mxu0 %vm64_vm1, %v42_v11 }
  0x38   :  { %729 = vmatprep.mubr.msk.f32.mxu0 %vm864_vm0, %v865_v1 }
 0x102   :  { %v140_v12 = vpop.f32.mrb[0].mxu0 }
 0x103   :  { %v692_v13 = vpop.f32.mrb[1].mxu0  ;;  %704 = vmatmul.mubr.msk.f32.vlgmr.msra.gmra.mrb[0].mxu1 %vm158_vm2, %v140_v12 }
 0x104   :  { %706 = vmatprep.mubr.msk.f32.mxu1 %vm864_vm0, %v865_v1 }
 0x106   :  { %v145_v14 = vpop.f32.mrb[2].mxu0 }
 0x107   :  { %v695_v15 = vpop.f32.mrb[3].mxu0  ;;  %707 = vmatmul.mubr.msk.f32.gmra.mrb[2].mxu1 %vm158_vm2, %v145_v14 }
 0x108   :  { %709 = vmatprep.mubr.msk.f32.mxu1 %vm864_vm0, %v865_v1 }
 0x10a   :  { %v150_v16 = vpop.f32.mrb[4].mxu0 }
 0x10b   :  { %v698_v17 = vpop.f32.mrb[5].mxu0  ;;  %710 = vmatmul.mubr.msk.f32.gmra.mrb[4].mxu1 %vm158_vm2, %v150_v16 }
 0x10c   :  { %718 = vmatprep.mubr.msk.f32.mxu1 %vm864_vm0, %v865_v1 }
 0x1d6   :  { %v234_v25 = vpop.f32.mrb[0].mxu1 }
 0x1d7   :  { %v705_v26 = vpop.f32.mrb[1].mxu1  ;;  %v235_v27 = vadd.f32 %v644_v24, %v234_v25 }
 0x1d9   :  { %v248_v31 = vmax.f32 %v235_v27, 0.0 }
 0x1da   :  { %v239_v28 = vpop.f32.mrb[2].mxu1 }
 0x1db   :  { %v240_v29 = vadd.f32 %v644_v24, %v239_v28  ;;  %v708_v30 = vpop.f32.mrb[3].mxu1 }
 0x1dd   :  { %v249_v32 = vmax.f32 %v240_v29, 0.0 }
 0x1de   :  { %v244_v33 = vpop.f32.mrb[4].mxu1 }
 0x1df   :  { %v762_v34 = vpack.c.bf16 %v249_v32, %v248_v31  ;;  %v245_v35 = vadd.f32 %v644_v24, %v244_v33  ;;  %v711_v36 = vpop.f32.mrb[5].mxu1 }
 0x1e1   :  { %v250_v37 = vmax.f32 %v245_v35, 0.0  ;;  %763 = vmatpush3.bf16.msra.mxu1 %v762_v34 }
 0x1e2   :  { %716 = vmatprep.subr.mxu1 %v865_v1 }
 0x1e5   :  { %717 = vmatpush3.msra.mxu1 %v250_v37 }
 0x1e6   :  { %719 = vmatmul.mubr.msk.f32.vlgmr.msra.gmra.mrb[6].mxu1 %vm64_vm1, %v46_v38  ;;  %773 = vmatprep.subr.bf16.mxu1 %v863_v0 }
 0x1e7   :  { %752 = vmatprep.mubr.msk.f32.mxu1 %vm864_vm0, %v865_v1  ;;  %775 = vmatpush3.bf16.msra.mxu1 %v774_v51 }
 0x1e8   :  { %776 = vmatprep.subr.bf16.mxu1 %v863_v0 }
 0x1eb   :  { %778 = vmatpush3.bf16.msra.mxu1 %v777_v53 }
 0x2b9   :  { %v320_v39 = vpop.f32.mrb[6].mxu1 }
 0x2ba   :  { %v720_v40 = vpop.f32.mrb[7].mxu1  ;;  %730 = vmatmul.mubr.msk.f32.vlgmr.msra.gmra.mrb[6].mxu0 %vm324_vm3, %v320_v39 }
 0x2bb   :  { %736 = vmatprep.mubr.msk.f32.mxu0 %vm864_vm0, %v865_v1  ;;  %772 = vmatpush3.bf16.msra.mxu0 %v771_v43 }
 0x2bc   :  { %739 = vmatprep.subr.mxu0 %v865_v1 }
 0x38d   :  { %v394_v45 = vpop.f32.mrb[6].mxu0 }
 0x38e   :  { %v395_v46 = vadd.f32 %v394_v45, %v47_v44  ;;  %v731_v47 = vpop.f32.mrb[7].mxu0 }
 0x390   :  { %737 = vmatmul.mubr.msk.f32.vlgmr.msra.gmra.mrb[8].mxu0 %vm158_vm2, %v395_v46 }
 0x391   :  { %741 = vmatprep.mubr.msk.f32.mxu0 %vm864_vm0, %v865_v1 }
 0x463   :  { %v471_v55 = vpop.f32.mrb[8].mxu0 }
 0x464   :  { %v472_v56 = vadd.f32 %v650_v54, %v471_v55  ;;  %v738_v57 = vpop.f32.mrb[9].mxu0 }
 0x466   :  { %v475_v58 = vmax.f32 %v472_v56, 0.0 }
 0x468   :  { %740 = vmatpush3.msra.mxu0 %v475_v58 }
 0x469   :  { %742 = vmatmul.mubr.msk.f32.vlgmr.msra.gmra.mrb[10].mxu0 %vm476_vm4, %v48_v59 }
 0x53c   :  { %v546_v60 = vpop.f32.mrb[10].mxu0 }
 0x53d   :  { %v743_v61 = vpop.f32.mrb[11].mxu0  ;;  %753 = vmatmul.mubr.msk.f32.vlgmr.msra.gmra.mrb[8].mxu1 %vm324_vm3, %v546_v60 }
 0x610   :  { %v619_v63 = vpop.f32.mrb[8].mxu1 }
 0x611   :  { %v620_v0 = vadd.f32 %v619_v63, %v63_v62  ;;  %v754_v1 = vpop.f32.mrb[9].mxu1 }
 0x613   :  { %624 = vst.msk [vmem:[#allocation7] sm:$0x1] %vm623_vm5, %v620_v0 }
 0x614   :  { %842 = shalt.err (!%p839_p6)
}
 0x615   :  { %s843_s11 = scalar_lea.hbm %s963_s2, 16 }
 0x616   :  { %p844_p7 = scmp.ne.s32.totalorder %s963_s2, %s843_s11  ;;  %p847_p8 = scmp.lt.u32.totalorder %s843_s11, %s963_s2 }
 0x618   :  { %p849_p9 = pnand %p847_p8, %p844_p7 }
 0x61a   :  { %852 = shalt.err (!%p849_p9)
}
 0x61b   :  { %634 = dma.vmem_to_hbm [thread:$0]  %s632_s6, 16, %s963_s2, [#allocation4]  }
 0x61c   :  { %857 = dma.done.wait [#allocation4], 16  }
 0x61d   :  { %858 = vsyncadd [#allocation4], 4294967280 }
 0x61e   :  { %638 = vsyncpa [#allocation3], 1 }
 0x61f   :  { %639 = vsyncpa [#allocation6], 1 }
 0x620   :  { %640 = vsyncpa [#allocation4], 1 }

</bundles_post_ra>
